<compile_context>
chip_gen: v6e
topology: v6e:2x2x1
jax: 0.10.0
libtpu: 0.0.40
codegen_flags: <defaults>
</compile_context>

<pallas_src>
import functools
import math

import jax
import jax.numpy as jnp
from jax.experimental import pallas as pl
from jax.experimental.pallas import tpu as pltpu


# ----------------------------- kernels ------------------------------------ #

def _pe_add_kernel(x_ref, pe_ref, o_ref):
    # eval-mode forward: x + pe (dropout is identity in eval, as in torch)
    o_ref[...] = x_ref[...] + pe_ref[...]


def _pe_add_dropout_kernel(x_ref, pe_ref, bits_ref, o_ref, *, threshold, scale):
    # train-mode forward: inverted dropout applied to (x + pe)
    # keep element iff its uint32 random bits >= threshold  (P(keep) = 1 - rate)
    y = (x_ref[...] + pe_ref[...]) * jnp.asarray(scale, o_ref.dtype)
    keep = bits_ref[...] >= jnp.uint32(threshold)
    o_ref[...] = jnp.where(keep, y, jnp.zeros_like(y))


# ----------------------------- helpers ------------------------------------ #

def _choose_seq_tile(S, D, *, n_streams, budget_bytes=12 * 1024 * 1024,
                     bytes_per_elem=4):
    """Pick a seq-tile size so n_streams x 2 buffers x tile fits the budget."""
    max_tile_bytes = budget_bytes // (2 * n_streams)
    rows = max(1, max_tile_bytes // (D * bytes_per_elem))
    if rows >= S:
        return S                      # whole sequence fits in one tile
    ts = max(8, (rows // 8) * 8)      # keep sublane-aligned
    return min(ts, S)


def make_positional_encoding(d_model: int, seq_len: int, dtype=jnp.float32):
    """Builds the (1, seq_len, d_model) PE buffer exactly as the PyTorch __init__."""
    position = jnp.arange(seq_len, dtype=jnp.float32)[:, None]
    sin_div = jnp.exp(
        jnp.arange(0, d_model, 2, dtype=jnp.float32) * (-math.log(10000.0) / d_model))
    cos_div = jnp.exp(
        jnp.arange(1, d_model, 2, dtype=jnp.float32) * (-math.log(10000.0) / d_model))
    pe = jnp.zeros((seq_len, d_model), dtype=jnp.float32)
    pe = pe.at[:, 0::2].set(jnp.sin(position * sin_div))
    pe = pe.at[:, 1::2].set(jnp.cos(position * cos_div))
    return pe[None, :, :].astype(dtype)


# ----------------------------- wrapper ------------------------------------ #

def positional_encoding_forward(x, pe, *, dropout_rate=0.0, training=False,
                                rng_key=None):
    """x: (B, S, D); pe: (1, seq_len, D) with seq_len >= S."""
    B, S, D = x.shape
    pe_slice = pe[:, :S, :].astype(x.dtype)   # matches self.pe[:, :x.shape[1], :]

    if not (training and dropout_rate > 0.0):
        # eval path: dropout is identity
        ts = _choose_seq_tile(S, D, n_streams=3)
        grid = (pl.cdiv(S, ts), B)
        grid_spec = pltpu.PrefetchScalarGridSpec(
            num_scalar_prefetch=0,
            grid=grid,
            in_specs=[
                pl.BlockSpec((1, ts, D), lambda s, b: (b, s, 0)),   # x
                pl.BlockSpec((1, ts, D), lambda s, b: (0, s, 0)),   # pe (const over b)
            ],
            out_specs=pl.BlockSpec((1, ts, D), lambda s, b: (b, s, 0)),
        )
        return pl.pallas_call(
            _pe_add_kernel,
            out_shape=jax.ShapeDtypeStruct(x.shape, x.dtype),
            grid_spec=grid_spec,
            compiler_params=pltpu.CompilerParams(
                dimension_semantics=("parallel", "parallel")),
        )(x, pe_slice)

    # training path: fused add + inverted dropout
    if rng_key is None:
        rng_key = jax.random.PRNGKey(0)
    bits = jax.random.bits(rng_key, x.shape, dtype=jnp.uint32)
    threshold = min(int(float(dropout_rate) * (1 << 32)), (1 << 32) - 1)
    scale = 1.0 / (1.0 - float(dropout_rate))
    kernel = functools.partial(
        _pe_add_dropout_kernel, threshold=threshold, scale=scale)

    ts = _choose_seq_tile(S, D, n_streams=4)
    grid = (pl.cdiv(S, ts), B)
    grid_spec = pltpu.PrefetchScalarGridSpec(
        num_scalar_prefetch=0,
        grid=grid,
        in_specs=[
            pl.BlockSpec((1, ts, D), lambda s, b: (b, s, 0)),   # x
            pl.BlockSpec((1, ts, D), lambda s, b: (0, s, 0)),   # pe (const over b)
            pl.BlockSpec((1, ts, D), lambda s, b: (b, s, 0)),   # random bits
        ],
        out_specs=pl.BlockSpec((1, ts, D), lambda s, b: (b, s, 0)),
    )
    return pl.pallas_call(
        kernel,
        out_shape=jax.ShapeDtypeStruct(x.shape, x.dtype),
        grid_spec=grid_spec,
        compiler_params=pltpu.CompilerParams(
            dimension_semantics=("parallel", "parallel")),
    )(x, pe_slice, bits)


# ------------------------------- main -------------------------------------- #

if __name__ == "__main__":
    d_model = 32
    seq_len = 8
    batch = 2
    dropout = 0.1  # only active in training mode; eval mode is identity (as in torch)

    key = jax.random.PRNGKey(0)
    k_x, k_drop = jax.random.split(key)
    x = jax.random.normal(k_x, (batch, seq_len, d_model), dtype=jnp.float32)

    pe = make_positional_encoding(d_model, seq_len)

    # eval-mode forward (dropout == identity), deterministic
    out = positional_encoding_forward(x, pe, dropout_rate=dropout, training=False)
    out = jax.block_until_ready(out)

    ref = x + pe[:, :seq_len, :]
    assert out.shape == x.shape and out.dtype == x.dtype
    assert jnp.allclose(out, ref, atol=1e-6, rtol=1e-6)

    # training-mode forward (fused add + inverted dropout), deterministic given key
    out_train = positional_encoding_forward(
        x, pe, dropout_rate=dropout, training=True, rng_key=k_drop)
    out_train = jax.block_until_ready(out_train)

    bits_ref = jax.random.bits(k_drop, x.shape, dtype=jnp.uint32)
    thr = jnp.uint32(min(int(dropout * (1 << 32)), (1 << 32) - 1))
    scale_ref = jnp.asarray(1.0 / (1.0 - dropout), x.dtype)
    ref_train = jnp.where(bits_ref >= thr, ref * scale_ref, 0.0).astype(x.dtype)
    assert out_train.shape == x.shape and out_train.dtype == x.dtype
    assert jnp.allclose(out_train, ref_train, atol=1e-5, rtol=1e-5)

    print("KERNEL_OK")
</pallas_src>

<mosaic_0001>
module attributes {stable_mosaic.version = 11 : i64} {
  func.func @_pe_add_kernel(%arg0: i32, %arg1: i32, %arg2: memref<1x8x32xf32, #tpu.memory_space<vmem>>, %arg3: memref<1x8x32xf32, #tpu.memory_space<vmem>>, %arg4: memref<1x8x32xf32, #tpu.memory_space<vmem>>) attributes {dimension_semantics = [#tpu.dimension_semantics<parallel>, #tpu.dimension_semantics<parallel>], iteration_bounds = array<i64: 1, 2>, scalar_prefetch = 0 : i64, scratch_operands = 0 : i64, tpu.core_type = #tpu.core_type<tc>, window_params = [{transform_indices = @transform_0, window_bounds = array<i64: 1, 8, 32>}, {transform_indices = @transform_1, window_bounds = array<i64: 1, 8, 32>}, {transform_indices = @transform_2, window_bounds = array<i64: 1, 8, 32>}]} {
    %c0 = arith.constant 0 : index
    %c0_0 = arith.constant 0 : index
    %c0_1 = arith.constant 0 : index
    %0 = vector.load %arg2[%c0, %c0_0, %c0_1] : memref<1x8x32xf32, #tpu.memory_space<vmem>>, vector<1x8x32xf32>
    %c0_2 = arith.constant 0 : index
    %c0_3 = arith.constant 0 : index
    %c0_4 = arith.constant 0 : index
    %1 = vector.load %arg3[%c0_2, %c0_3, %c0_4] : memref<1x8x32xf32, #tpu.memory_space<vmem>>, vector<1x8x32xf32>
    %2 = arith.addf %0, %1 : vector<1x8x32xf32>
    %c0_5 = arith.constant 0 : index
    %c0_6 = arith.constant 0 : index
    %c0_7 = arith.constant 0 : index
    %3 = vector.load %arg4[%c0_5, %c0_6, %c0_7] : memref<1x8x32xf32, #tpu.memory_space<vmem>>, vector<1x8x32xf32>
    tpu.vector_store %arg4[%c0_5, %c0_6, %c0_7], %2 {strides = array<i32>} : memref<1x8x32xf32, #tpu.memory_space<vmem>>, vector<1x8x32xf32>,
    return
  }
  func.func @transform_0(%arg0: i32, %arg1: i32) -> (i32, i32, i32) {
    %c0_i32 = arith.constant 0 : i32
    %c0_i32_0 = arith.constant 0 : i32
    return %arg1, %arg0, %c0_i32 : i32, i32, i32
  }
  func.func @transform_1(%arg0: i32, %arg1: i32) -> (i32, i32, i32) {
    %c0_i32 = arith.constant 0 : i32
    %c0_i32_0 = arith.constant 0 : i32
    %c0_i32_1 = arith.constant 0 : i32
    return %c0_i32, %arg0, %c0_i32_0 : i32, i32, i32
  }
  func.func @transform_2(%arg0: i32, %arg1: i32) -> (i32, i32, i32) {
    %c0_i32 = arith.constant 0 : i32
    %c0_i32_0 = arith.constant 0 : i32
    return %arg1, %arg0, %c0_i32 : i32, i32, i32
  }
}

</mosaic_0001>

<bundles_post_ra>
// kernel: tpu_custom_call.1
= control target key start
LH: loop header
LB: loop body
LE: loop exit
PB: predicated region body
PF: predicated region fallthrough
CT: control target
= control target key end

     0   :  { %7 = vsyncpa [#allocation3], 0  ;;  %s715_s0 = inlined_call_operand.hbm [shape: f32[2,8,32], index: 0, kind: input, shape index: {}]   ;;  %s716_s1 = inlined_call_operand.hbm [shape: f32[1,8,32], index: 1, kind: input, shape index: {}]   ;;  %s717_s2 = inlined_call_operand.hbm [shape: f32[2,8,32], index: 2, kind: output, shape index: {}]  }
   0x1   :  { %9 = vsyncpa [#allocation3 + $0x1], 0 }
   0x2   :  { %10 = vsyncpa [#allocation6], 0 }
   0x3   :  { %11 = vsyncpa [#allocation4], 0 }
   0x4   :  { %13 = vsyncpa [#allocation4 + $0x1], 0  ;;  %s554_s9 = smov 0   ;;  %s556_s10 = smov 0  }
   0x5   :  { %s558_s11 = smov 0   ;;  %s560_s12 = smov 0  }
   0x6   :  { %s562_s13 = smov 0   ;;  %s564_s14 = smov 0  }
   0x7 LB: > { %s308_s15 = sadd.s32 4294967295, %s534_s14   ;;  %s309_s16 = sadd.s32 4294967294, %s534_s14   ;;  %s534_s14 = sphi %s564_s14, %s19_s14   ;;  %s530_s13 = sphi %s562_s13, %s734_s13   ;;  %s526_s12 = sphi %s560_s12, %s733_s12   ;;  %s522_s11 = sphi %s558_s11, %s732_s11   ;;  %s518_s10 = sphi %s556_s10, %s731_s10   ;;  %s514_s9 = sphi %s554_s9, %s730_s9  }
   0x8   : > { %p53_p0 = scmp.ne.s32.totalorder %s518_s10, %s514_s9  ;;  %p588_p1 = scmp.eq.s32.totalorder %s308_s15, 0 }
   0x9   : > { %p592_p2 = scmp.eq.s32.totalorder %s308_s15, 1  ;;  %p111_p3 = scmp.eq.s32.totalorder %s309_s16, 1 }
   0xa   : > { %p598_p4 = por %p588_p1, %p53_p0  ;;  %p310_p5 = scmp.ge.s32.totalorder %s534_s14, 1 }
   0xb   : > { %p603_p6 = por %p111_p3, %p53_p0  ;;  %p118_p7 = scmp.lt.s32.totalorder %s534_s14, 3 }
   0xc   : > { %s721_s19 = scalar_select %p598_p4, 1, 0 }
   0xd   : > { %s722_s20 = scalar_select %p603_p6, 1, 0 }
   0xe   : > { %p608_p8 = pnand %p310_p5, %p118_p7  ;;  %s536_s22 = smov [#allocation5]  }
   0xf   : > { %s133_s23 = sshll.u32 %s536_s22, 4  ;;  %s28_s25 = sadd.s32 1, %s530_s13  ;;  %s134_s23 = int_to_ptr.vmem [resolvable:$true] %s133_s23 }
  0x10   : > { %p331_p10 = pneg %p608_p8  ;;  %s40_s26 = sadd.s32 1, %s522_s11 }
  0x11   : > { %p29_p12 = scmp.ge.s32.totalorder %s28_s25, 2  ;;  %s407_s27 = scalar_lea.vmem %s134_s23, 128 }
  0x12   : > { %p617_p11 = pnand %p331_p10, %p588_p1  ;;  %p408_p0 = scmp.ne.s32.totalorder %s134_s23, %s407_s27 }
  0x13   : > { %p415_p7 = scmp.lt.s32.totalorder %s134_s23, %s134_s23  ;;  %p416_p6 = scmp.lt.s32.totalorder %s407_s27, %s407_s27 }
  0x14   : > { %p398_p13 = pneg %p617_p11 }
  0x15   : > { %p417_p9 = por %p416_p6, %p415_p7 }
  0x16   : > { %p410_p3 = pnand %p408_p0, %p398_p13 }
  0x18   : > { %p411_p5 = pneg %p410_p3 }
  0x1a   : > { %p418_p4 = pnand %p417_p9, %p411_p5 }
  0x1c   : > { %421 = shalt.err (!%p418_p4)
}
  0x1d   : > { %334 = dma.hbm_to_vmem [thread:$0]  (!%p617_p11), %s716_s1, 128, %s134_s23, [#allocation6]  }
  0x1e   : > { %s736_s25 = smov (%p29_p12, %s28_s25), 0  ;;  %p47_p6 = scmp.ne.s32.totalorder %s522_s11, %s518_s10 }
  0x1f   : > { %p48_p4 = scmp.eq.s32.totalorder %s534_s14, 0  ;;  %s35_s30 = ssub.s32 %s530_s13, %s736_s25 }
  0x20   : > { %p344_p9 = scmp.lt.s32.totalorder %s534_s14, 2  ;;  %p38_p10 = scmp.eq.s32.totalorder %s35_s30, 0 }
  0x21   : > { %p49_p13 = por %p48_p4, %p47_p6  ;;  %p640_p0 = por %p592_p2, %p47_p6 }
  0x22   : > { %s144_s4 = sand.u32 1, %s522_s11   ;;  %s314_s7 = sshll.u32 %s530_s13, 7 }
  0x23   : > { %s646_s5 = scalar_select %p38_p10, %s522_s11, %s40_s26  }
  0x24   : > { %s313_s6 = sshll.u32 %s144_s4, 3  ;;  %s154_s16 = scalar_lea.hbm %s715_s0, %s314_s7 }
  0x25   : > { %s148_s22 = scalar_lea.vmem [#allocation2], %s313_s6  ;;  %p652_p11 = pnand %p344_p9, %p49_p13 }
  0x26   : > { %s156_s23 = sshll.u32 %s148_s22, 4  ;;  %s145_s18 = scalar_lea.sflag [#allocation3], %s144_s4  ;;  %s157_s23 = int_to_ptr.vmem [resolvable:$true] %s156_s23 }
  0x27   : > { %p424_p2 = pneg %p652_p11  ;;  %s435_s27 = scalar_lea.vmem %s157_s23, 128 }
  0x28   : > { %p436_p12 = scmp.ne.s32.totalorder %s157_s23, %s435_s27  ;;  %s537_s26 = smov [#allocation2]  }
  0x29   : > { %s440_s28 = sshll.u32 %s537_s26, 4  ;;  %s441_s28 = int_to_ptr.vmem [resolvable:$false] %s440_s28 }
  0x2a   : > { %p438_p3 = pnand %p436_p12, %p424_p2  ;;  %s442_s29 = scalar_lea.vmem %s441_s28, 256 }
  0x2b   : > { %p443_p7 = scmp.lt.s32.totalorder %s157_s23, %s441_s28  ;;  %p444_p6 = scmp.lt.s32.totalorder %s442_s29, %s435_s27 }
  0x2c   : > { %p439_p5 = pneg %p438_p3 }
  0x2d   : > { %p445_p4 = por %p444_p6, %p443_p7 }
  0x2f   : > { %p446_p10 = pnand %p445_p4, %p439_p5 }
  0x31   : > { %449 = shalt.err (!%p446_p10)
}
  0x32   : > { %338 = dma.hbm_to_vmem [thread:$0]  (!%p652_p11), %s154_s16, 128, %s157_s23, %s145_s18  }
  0x33   : > { %165 = sbr.rel (%p608_p8) target bundleno = 83 (0x53), region = 28  ;;  %s663_s30 = sand.u32 (!%p608_p8), 1, %s518_s10  }
  0x34   : > { %s316_s4 = sshll.u32 (!%p608_p8), %s663_s30, 3  ;;  %s168_s6 = scalar_lea.sflag (!%p608_p8), [#allocation3], %s663_s30 }
  0x35   : > { %s171_s7 = scalar_lea.vmem (!%p608_p8), [#allocation2], %s316_s4  ;;  %p727_p9 = scmp.ne.s32.totalorder (!%p608_p8), %s721_s19, 0 }
  0x38   : > { %501 = dma.done.wait (%p727_p9), %s168_s6, 128  }
  0x39   : > { %503 = vsyncadd (%p727_p9), %s168_s6, 4294967168 }
  0x3a   : > { %505 = dma.done.wait (%p588_p1), [#allocation6], 128  }
  0x3b   : > { %507 = vsyncadd (%p588_p1), [#allocation6], 4294967168  ;;  %s195_s21 = scalar_lea.vmem [#allocation7], %s316_s4  ;;  %s320_s15 = sshll.u32 %s526_s12, 7  ;;  %v196_v0 = vld [vmem:[%s171_s7] sm:$0xff]  ;;  %v197_v1 = vld [vmem:[#allocation5] sm:$0xff] }
  0x3c   : > { %s216_s8 = sshll.u32 %s195_s21, 4  ;;  %vm199_vm0 = vcmask 261120   ;;  %v198_v2 = vadd.f32 %v197_v1, %v196_v0  ;;  %s214_s22 = scalar_lea.hbm %s717_s2, %s320_s15  ;;  %s217_s8 = int_to_ptr.vmem [resolvable:$true] %s216_s8 }
  0x3d   : > { %s202_s23 = scalar_lea.sflag [#allocation4], %s663_s30  ;;  %s450_s24 = scalar_lea.vmem %s217_s8, 128 }
  0x3e   : > { %200 = vst.msk [vmem:[%s195_s21] sm:$0xff] %vm199_vm0, %v198_v2  ;;  %p451_p8 = scmp.ne.s32.totalorder %s217_s8, %s450_s24  ;;  %s538_s17 = smov [#allocation7]  }
  0x3f   : > { %s454_s18 = sshll.u32 %s538_s17, 4  ;;  %s455_s18 = int_to_ptr.vmem [resolvable:$false] %s454_s18 }
  0x40   : > { %p452_p1 = pnand %p451_p8, %p640_p0  ;;  %s456_s12 = scalar_lea.vmem %s455_s18, 256 }
  0x41   : > { %p457_p11 = scmp.lt.s32.totalorder %s217_s8, %s455_s18  ;;  %p458_p2 = scmp.lt.s32.totalorder %s456_s12, %s450_s24 }
  0x42   : > { %p453_p13 = pneg %p452_p1 }
  0x43   : > { %p459_p12 = por %p458_p2, %p457_p11 }
  0x45   : > { %p460_p3 = pnand %p459_p12, %p453_p13 }
  0x47   : > { %463 = shalt.err (!%p460_p3)
}
  0x48   : > { %s464_s27 = scalar_lea.hbm %s214_s22, 128  ;;  %s468_s29 = scalar_lea.hbm %s717_s2, 256 }
  0x49   : > { %p465_p5 = scmp.ne.s32.totalorder %s214_s22, %s464_s27  ;;  %p469_p4 = scmp.lt.s32.totalorder %s214_s22, %s717_s2 }
  0x4a   : > { %p470_p10 = scmp.lt.s32.totalorder %s468_s29, %s464_s27 }
  0x4b   : > { %p466_p7 = pnand %p465_p5, %p640_p0 }
  0x4c   : > { %p471_p9 = por %p470_p10, %p469_p4 }
  0x4d   : > { %p467_p6 = pneg %p466_p7 }
  0x4f   : > { %p472_p8 = pnand %p471_p9, %p467_p6 }
  0x51   : > { %475 = shalt.err (!%p472_p8)
}
  0x52   : > { %329 = dma.vmem_to_hbm [thread:$0]  (%p640_p0), %s217_s8, 128, %s214_s22, %s202_s23  }
  0x53 PF: > { %s228_s6 = sand.u32 1, %s514_s9   ;;  %p728_p1 = scmp.ne.s32.totalorder %s722_s20, 0 }
  0x54   : > { %p729_p13 = scmp.ge.s32.totalorder %s534_s14, 2  ;;  %s229_s7 = scalar_lea.sflag [#allocation4], %s228_s6 }
  0x56   : > { %p340_p11 = pnand %p729_p13, %p728_p1 }
  0x58   : > { %p341_p2 = pneg %p340_p11 }
  0x5a   : > { %509 = dma.done.wait (%p341_p2), %s229_s7, 128  }
  0x5b   : > { %511 = vsyncadd (%p341_p2), %s229_s7, 4294967168  ;;  %s19_s14 = sadd.s32 1, %s534_s14   ;;  %s730_s9 = smov %s518_s10 }
  0x5c   : > { %p16_p12 = scmp.ge.s32.totalorder %s19_s14, 4   ;;  %s731_s10 = smov %s522_s11 }
  0x5d   : > { %s732_s11 = smov %s646_s5  ;;  %s733_s12 = smov %s530_s13 }
  0x5e   : > { %s734_s13 = smov %s736_s25  ;;  %18 = sbr.rel (!%p16_p12) target bundleno = 7 (0x7), region = 78 }
  0x63   :  { %234 = vsyncpa [#allocation3], 1 }
  0x64   :  { %236 = vsyncpa [#allocation3 + $0x1], 1 }
  0x65   :  { %237 = vsyncpa [#allocation6], 1 }
  0x66   :  { %238 = vsyncpa [#allocation4], 1 }
  0x67   :  { %240 = vsyncpa [#allocation4 + $0x1], 1 }

</bundles_post_ra>
